<compile_context>
chip_gen: v7x
topology: tpu7x:2x2x1
jax: 0.10.0
libtpu: 0.0.40
codegen_flags: <defaults>
</compile_context>

<pallas_src>
import functools

import jax
import jax.numpy as jnp
from jax.experimental import pallas as pl
from jax.experimental.pallas import tpu as pltpu

# Model dimensions (from the PyTorch module __init__)
VAE_IN = 392
VAE_HID = VAE_IN // 2          # 196
VAE_EMBED = 64
STATE_IN = 64
ACTION_IN = 300
STATE_REP = STATE_IN // 2      # 32
ACTION_REP = ACTION_IN // 3    # 100
DISC_HID = 32

_BF16 = jnp.bfloat16
_F32 = jnp.float32


def _round_up(x, m):
    return ((x + m - 1) // m) * m


def _leaky_relu(v, slope=0.2):
    return jnp.where(v > 0, v, slope * v)


def reward_agent_kernel(
    state_ref, t_ref,                        # per-tile: f32 state, folded-action term
    w1_ref, b1_ref, w2_ref, b2_ref,          # AutoEncoder encoder (weights bf16, biases f32)
    ws_ref, bs_ref,                          # discriminator state_rep
    wm1s_ref, bm1_ref,                       # state half of Linear(132, 32); action half is folded into t
    wm2_ref, bm2_ref,                        # Linear(32, 32)
    wm3_ref, bm3_ref,                        # Linear(32, 1) stored as a [1, 32] bf16 row
    out_ref,                                 # [1, 1, tile_b] lane-dense output block
):
    f32 = _F32
    bf16 = _BF16

    # f32 state arrives straight from HBM; cast to bf16 in VMEM (no wrapper copy).
    x = state_ref[...].astype(bf16)                                          # [TB, 392] bf16
    t = t_ref[...]                                                           # [TB, 32] f32 == leaky_relu(a1) @ Wm1_a

    # --- AutoEncoder.get_embed (dropouts are identity in eval mode) ---
    h1 = jnp.tanh(jnp.dot(x, w1_ref[...], preferred_element_type=f32) + b1_ref[...])
    z = jnp.tanh(jnp.dot(h1.astype(bf16), w2_ref[...], preferred_element_type=f32) + b2_ref[...])

    # --- WoZDiscriminator ---
    s1 = jnp.dot(z.astype(bf16), ws_ref[...], preferred_element_type=f32) + bs_ref[...]

    # LeakyReLU(0.2) on cat([s1, a1]) then Linear(132, 32) == split matmul; the
    # action half is the precomputed table gather `t` (exact rewrite).
    h = (jnp.dot(_leaky_relu(s1).astype(bf16), wm1s_ref[...], preferred_element_type=f32)
         + t + bm1_ref[...])
    h = _leaky_relu(h)
    h = _leaky_relu(jnp.dot(h.astype(bf16), wm2_ref[...], preferred_element_type=f32) + bm2_ref[...])

    # Lane-dense 32 -> 1 projection: [1,32] . [TB,32]^T -> [1, TB] (rhs-contracted
    # bf16 matmul, same dot_general pattern as flash-attn 'bqd,bkd->bqk').
    logit = jax.lax.dot_general(
        wm3_ref[...], h.astype(bf16),
        dimension_numbers=(((1,), (1,)), ((), ())),
        preferred_element_type=f32) + bm3_ref[...]                           # [1, TB]

    validity = jnp.clip(jax.nn.sigmoid(logit), 1e-7, 1.0 - 1e-7)
    out_ref[...] = validity[None]                                            # [1, 1, TB]


def init_params(key):
    """f32 master weights, PyTorch default init U(-1/sqrt(fan_in), 1/sqrt(fan_in)).
    Weights stored [in, out], biases [1, out]."""
    def linear(key, fan_in, fan_out):
        kw, kb = jax.random.split(key)
        bound = 1.0 / (fan_in ** 0.5)
        w = jax.random.uniform(kw, (fan_in, fan_out), _F32, -bound, bound)
        b = jax.random.uniform(kb, (1, fan_out), _F32, -bound, bound)
        return w, b

    keys = jax.random.split(key, 8)
    w1, b1 = linear(keys[0], VAE_IN, VAE_HID)                       # 392 -> 196
    w2, b2 = linear(keys[1], VAE_HID, VAE_EMBED)                    # 196 -> 64
    ws, bs = linear(keys[2], STATE_IN, STATE_REP)                   # 64 -> 32
    wa, ba = linear(keys[3], ACTION_IN, ACTION_REP)                 # 300 -> 100
    wm1, bm1 = linear(keys[4], STATE_REP + ACTION_REP, DISC_HID)    # 132 -> 32
    wm2, bm2 = linear(keys[5], DISC_HID, DISC_HID)                  # 32 -> 32
    wm3, bm3 = linear(keys[6], DISC_HID, 1)                         # 32 -> 1
    return dict(w1=w1, b1=b1, w2=w2, b2=b2, ws=ws, bs=bs, wa=wa, ba=ba,
                wm1=wm1, bm1=bm1, wm2=wm2, bm2=bm2, wm3=wm3, bm3=bm3)


def prepare_kernel_params(p):
    """Derive kernel-ready params: bf16 MXU weights, split Wm1, folded action table."""
    # Exact fold (f32): leaky_relu is per-element per action row, so
    # leaky_relu(Wa[a] + ba) @ Wm1_a == (leaky_relu(Wa + ba) @ Wm1_a)[a].
    act_table = _leaky_relu(p["wa"] + p["ba"]) @ p["wm1"][STATE_REP:, :]     # [300, 32] f32
    return dict(
        w1=p["w1"].astype(_BF16), b1=p["b1"],
        w2=p["w2"].astype(_BF16), b2=p["b2"],
        ws=p["ws"].astype(_BF16), bs=p["bs"],
        wm1_s=p["wm1"][:STATE_REP, :].astype(_BF16), bm1=p["bm1"],
        wm2=p["wm2"].astype(_BF16), bm2=p["bm2"],
        wm3_row=p["wm3"].T.astype(_BF16),            # [1, 32] for the lane-dense projection
        bm3=p["bm3"],                                # [1, 1] f32
        act_table=act_table,                         # [300, 32] f32, gathered in the wrapper
    )


@functools.partial(jax.jit, static_argnames=("tile_b",))
def reward_agent_forward(state, actions, kparams, tile_b=None):
    """state: [B, 392] f32 (bf16 also accepted), actions: [B] int32 in [0, 300).
    Returns [B, 1] f32 validity in (1e-7, 1 - 1e-7)."""
    B = state.shape[0]
    if tile_b is None:
        # >= 2 grid steps whenever B allows it (lets v7x shard the "parallel"
        # batch axis over both TensorCores); cap at 1024 rows/tile — safe under
        # v5e's 16 MiB default scoped VMEM. On v6e, pass tile_b=2048 for a bit
        # more roofline if desired.
        tile_b = max(8, min(1024, _round_up((B + 1) // 2, 8)))
    assert tile_b % 8 == 0
    num_tiles = pl.cdiv(B, tile_b)
    Bp = num_tiles * tile_b

    # Folded action path: [B, 32] f32 gather (exact; replaces the one-hot matmul
    # AND the Wm1_a matmul). No jnp.pad: the last grid block is partial.
    t = kparams["act_table"][actions.reshape(-1)]                            # [B, 32] f32

    weights = (
        kparams["w1"], kparams["b1"], kparams["w2"], kparams["b2"],
        kparams["ws"], kparams["bs"],
        kparams["wm1_s"], kparams["bm1"],
        kparams["wm2"], kparams["bm2"],
        kparams["wm3_row"], kparams["bm3"],
    )

    def resident_spec(arr):
        # Full-array block, constant index_map -> stays VMEM-resident across grid steps.
        return pl.BlockSpec(arr.shape, lambda i: (0, 0))

    in_specs = (
        [pl.BlockSpec((tile_b, VAE_IN), lambda i: (i, 0)),       # f32 state tile
         pl.BlockSpec((tile_b, DISC_HID), lambda i: (i, 0))]     # folded-action tile
        + [resident_spec(w) for w in weights]
    )

    # Advisory cost estimate for the XLA scheduler.
    per_row_macs = (VAE_IN * VAE_HID + VAE_HID * VAE_EMBED + STATE_IN * STATE_REP
                    + STATE_REP * DISC_HID + DISC_HID * DISC_HID + DISC_HID)
    weight_bytes = sum(int(w.size) * w.dtype.itemsize for w in weights)
    cost = pl.CostEstimate(
        flops=2 * Bp * per_row_macs,
        transcendentals=Bp * (VAE_HID + VAE_EMBED + 1),
        bytes_accessed=Bp * (VAE_IN * 4 + DISC_HID * 4 + 4) + weight_bytes,
    )

    out = pl.pallas_call(
        reward_agent_kernel,
        out_shape=jax.ShapeDtypeStruct((num_tiles, 1, tile_b), _F32),        # lane-dense rows
        grid=(num_tiles,),
        in_specs=in_specs,
        out_specs=pl.BlockSpec((1, 1, tile_b), lambda i: (i, 0, 0)),
        compiler_params=pltpu.CompilerParams(
            dimension_semantics=("parallel",),       # v7x: shard batch tiles over both TCs
        ),
        cost_estimate=cost,
    )(state, t, *weights)

    # Tail rows of the last (partial) tile are garbage by construction; drop them.
    return out.reshape(-1)[:B].reshape(B, 1)


def reward_agent_reference_mirror(state, actions, kp):
    """Pure-JAX reference mirroring the kernel math (bf16 matmuls, f32 accumulate,
    folded action table)."""
    f32, bf16 = _F32, _BF16
    x = state.astype(bf16)
    t = kp["act_table"][actions.reshape(-1)]
    h1 = jnp.tanh(jnp.dot(x, kp["w1"], preferred_element_type=f32) + kp["b1"])
    z = jnp.tanh(jnp.dot(h1.astype(bf16), kp["w2"], preferred_element_type=f32) + kp["b2"])
    s1 = jnp.dot(z.astype(bf16), kp["ws"], preferred_element_type=f32) + kp["bs"]
    h = jnp.dot(_leaky_relu(s1).astype(bf16), kp["wm1_s"], preferred_element_type=f32) + t + kp["bm1"]
    h = _leaky_relu(h)
    h = _leaky_relu(jnp.dot(h.astype(bf16), kp["wm2"], preferred_element_type=f32) + kp["bm2"])
    logit = jnp.dot(h.astype(bf16), jnp.transpose(kp["wm3_row"]), preferred_element_type=f32) + kp["bm3"]
    return jnp.clip(jax.nn.sigmoid(logit), 1e-7, 1.0 - 1e-7)


def reward_agent_reference_f32(state, actions, p):
    """Full f32 reference of the original PyTorch math using the master weights."""
    onehot = jax.nn.one_hot(actions.reshape(-1), ACTION_IN, dtype=_F32)
    h1 = jnp.tanh(state @ p["w1"] + p["b1"])
    z = jnp.tanh(h1 @ p["w2"] + p["b2"])
    s1 = z @ p["ws"] + p["bs"]
    a1 = onehot @ p["wa"] + p["ba"]
    sa = _leaky_relu(jnp.concatenate([s1, a1], axis=1))
    h = _leaky_relu(sa @ p["wm1"] + p["bm1"])
    h = _leaky_relu(h @ p["wm2"] + p["bm2"])
    v = jax.nn.sigmoid(h @ p["wm3"] + p["bm3"])
    return jnp.clip(v, 1e-7, 1.0 - 1e-7)


if __name__ == "__main__":
    key = jax.random.PRNGKey(0)
    k_params, k_state, k_act = jax.random.split(key, 3)

    master = init_params(k_params)
    kparams = prepare_kernel_params(master)

    # batch_feed['states']: [B, 392] float, batch_feed['actions']: [B] long
    B = 8
    state = jax.random.normal(k_state, (B, VAE_IN), _F32)
    actions = jax.random.randint(k_act, (B,), 0, ACTION_IN, jnp.int32)

    reward = jax.block_until_ready(reward_agent_forward(state, actions, kparams))
    assert reward.shape == (B, 1)

    ref_mirror = reward_agent_reference_mirror(state, actions, kparams)
    ref_f32 = reward_agent_reference_f32(state, actions, master)
    assert jnp.allclose(reward, ref_mirror, atol=2e-3, rtol=2e-3), "mismatch vs bf16 mirror reference"
    assert jnp.allclose(reward, ref_f32, atol=5e-2, rtol=5e-2), "mismatch vs f32 reference"

    # Exercise the un-padded partial-last-tile + multi-tile path (B=20, tile_b=8 -> 3 tiles).
    B2 = 20
    k_state2, k_act2 = jax.random.split(jax.random.PRNGKey(1))
    state2 = jax.random.normal(k_state2, (B2, VAE_IN), _F32)
    actions2 = jax.random.randint(k_act2, (B2,), 0, ACTION_IN, jnp.int32)
    reward2 = jax.block_until_ready(reward_agent_forward(state2, actions2, kparams, tile_b=8))
    assert reward2.shape == (B2, 1)
    ref2 = reward_agent_reference_mirror(state2, actions2, kparams)
    assert jnp.allclose(reward2, ref2, atol=2e-3, rtol=2e-3), "mismatch on partial-tile batch"

    print("KERNEL_OK")
</pallas_src>

<mosaic_0001>
module attributes {stable_mosaic.version = 11 : i64} {
  func.func @reward_agent_kernel(%arg0: i32, %arg1: memref<8x392xf32, #tpu.memory_space<vmem>>, %arg2: memref<8x32xf32, #tpu.memory_space<vmem>>, %arg3: memref<392x196xbf16, #tpu.memory_space<vmem>>, %arg4: memref<1x196xf32, #tpu.memory_space<vmem>>, %arg5: memref<196x64xbf16, #tpu.memory_space<vmem>>, %arg6: memref<1x64xf32, #tpu.memory_space<vmem>>, %arg7: memref<64x32xbf16, #tpu.memory_space<vmem>>, %arg8: memref<1x32xf32, #tpu.memory_space<vmem>>, %arg9: memref<32x32xbf16, #tpu.memory_space<vmem>>, %arg10: memref<1x32xf32, #tpu.memory_space<vmem>>, %arg11: memref<32x32xbf16, #tpu.memory_space<vmem>>, %arg12: memref<1x32xf32, #tpu.memory_space<vmem>>, %arg13: memref<1x32xbf16, #tpu.memory_space<vmem>>, %arg14: memref<1x1xf32, #tpu.memory_space<vmem>>, %arg15: memref<1x1x8xf32, #tpu.memory_space<vmem>>) attributes {dimension_semantics = [#tpu.dimension_semantics<parallel>], iteration_bounds = array<i64: 1>, scalar_prefetch = 0 : i64, scratch_operands = 0 : i64, tpu.core_type = #tpu.core_type<tc>, window_params = [{transform_indices = @transform_0, window_bounds = array<i64: 8, 392>}, {transform_indices = @transform_1, window_bounds = array<i64: 8, 32>}, {pipeline_mode = #tpu.pipeline_mode<synchronous>, transform_indices = @transform_2, window_bounds = array<i64: 392, 196>}, {pipeline_mode = #tpu.pipeline_mode<synchronous>, transform_indices = @transform_3, window_bounds = array<i64: 1, 196>}, {pipeline_mode = #tpu.pipeline_mode<synchronous>, transform_indices = @transform_4, window_bounds = array<i64: 196, 64>}, {pipeline_mode = #tpu.pipeline_mode<synchronous>, transform_indices = @transform_5, window_bounds = array<i64: 1, 64>}, {pipeline_mode = #tpu.pipeline_mode<synchronous>, transform_indices = @transform_6, window_bounds = array<i64: 64, 32>}, {pipeline_mode = #tpu.pipeline_mode<synchronous>, transform_indices = @transform_7, window_bounds = array<i64: 1, 32>}, {pipeline_mode = #tpu.pipeline_mode<synchronous>, transform_indices = @transform_8, window_bounds = array<i64: 32, 32>}, {pipeline_mode = #tpu.pipeline_mode<synchronous>, transform_indices = @transform_9, window_bounds = array<i64: 1, 32>}, {pipeline_mode = #tpu.pipeline_mode<synchronous>, transform_indices = @transform_10, window_bounds = array<i64: 32, 32>}, {pipeline_mode = #tpu.pipeline_mode<synchronous>, transform_indices = @transform_11, window_bounds = array<i64: 1, 32>}, {pipeline_mode = #tpu.pipeline_mode<synchronous>, transform_indices = @transform_12, window_bounds = array<i64: 1, 32>}, {pipeline_mode = #tpu.pipeline_mode<synchronous>, transform_indices = @transform_13, window_bounds = array<i64: 1, 1>}, {transform_indices = @transform_14, window_bounds = array<i64: 1, 1, 8>}]} {
    %c0 = arith.constant 0 : index
    %c0_0 = arith.constant 0 : index
    %0 = vector.load %arg1[%c0, %c0_0] : memref<8x392xf32, #tpu.memory_space<vmem>>, vector<8x392xf32>
    %1 = arith.truncf %0 : vector<8x392xf32> to vector<8x392xbf16>
    %c0_1 = arith.constant 0 : index
    %c0_2 = arith.constant 0 : index
    %2 = vector.load %arg2[%c0_1, %c0_2] : memref<8x32xf32, #tpu.memory_space<vmem>>, vector<8x32xf32>
    %c0_3 = arith.constant 0 : index
    %c0_4 = arith.constant 0 : index
    %3 = vector.load %arg3[%c0_3, %c0_4] : memref<392x196xbf16, #tpu.memory_space<vmem>>, vector<392x196xbf16>
    %cst = arith.constant dense<0.000000e+00> : vector<8x196xf32>
    %4 = tpu.matmul %1, %3, %cst {dimension_numbers = #tpu.dot_dimension_numbers<[1], [0], [0], [1], [0, 0, 1, 1], [], []>} : vector<8x392xbf16>, vector<392x196xbf16>, vector<8x196xf32> -> vector<8x196xf32>
    %c0_5 = arith.constant 0 : index
    %c0_6 = arith.constant 0 : index
    %5 = vector.load %arg4[%c0_5, %c0_6] : memref<1x196xf32, #tpu.memory_space<vmem>>, vector<1x196xf32>
    %6 = vector.broadcast %5 : vector<1x196xf32> to vector<8x196xf32>
    %7 = arith.addf %4, %6 : vector<8x196xf32>
    %8 = math.tanh %7 : vector<8x196xf32>
    %9 = arith.truncf %8 : vector<8x196xf32> to vector<8x196xbf16>
    %c0_7 = arith.constant 0 : index
    %c0_8 = arith.constant 0 : index
    %10 = vector.load %arg5[%c0_7, %c0_8] : memref<196x64xbf16, #tpu.memory_space<vmem>>, vector<196x64xbf16>
    %cst_9 = arith.constant dense<0.000000e+00> : vector<8x64xf32>
    %11 = tpu.matmul %9, %10, %cst_9 {dimension_numbers = #tpu.dot_dimension_numbers<[1], [0], [0], [1], [0, 0, 1, 1], [], []>} : vector<8x196xbf16>, vector<196x64xbf16>, vector<8x64xf32> -> vector<8x64xf32>
    %c0_10 = arith.constant 0 : index
    %c0_11 = arith.constant 0 : index
    %12 = vector.load %arg6[%c0_10, %c0_11] : memref<1x64xf32, #tpu.memory_space<vmem>>, vector<1x64xf32>
    %13 = vector.broadcast %12 : vector<1x64xf32> to vector<8x64xf32>
    %14 = arith.addf %11, %13 : vector<8x64xf32>
    %15 = math.tanh %14 : vector<8x64xf32>
    %16 = arith.truncf %15 : vector<8x64xf32> to vector<8x64xbf16>
    %c0_12 = arith.constant 0 : index
    %c0_13 = arith.constant 0 : index
    %17 = vector.load %arg7[%c0_12, %c0_13] : memref<64x32xbf16, #tpu.memory_space<vmem>>, vector<64x32xbf16>
    %cst_14 = arith.constant dense<0.000000e+00> : vector<8x32xf32>
    %18 = tpu.matmul %16, %17, %cst_14 {dimension_numbers = #tpu.dot_dimension_numbers<[1], [0], [0], [1], [0, 0, 1, 1], [], []>} : vector<8x64xbf16>, vector<64x32xbf16>, vector<8x32xf32> -> vector<8x32xf32>
    %c0_15 = arith.constant 0 : index
    %c0_16 = arith.constant 0 : index
    %19 = vector.load %arg8[%c0_15, %c0_16] : memref<1x32xf32, #tpu.memory_space<vmem>>, vector<1x32xf32>
    %20 = vector.broadcast %19 : vector<1x32xf32> to vector<8x32xf32>
    %21 = arith.addf %18, %20 : vector<8x32xf32>
    %cst_17 = arith.constant 0.000000e+00 : f32
    %22 = vector.broadcast %cst_17 : f32 to vector<8x32xf32>
    %23 = arith.cmpf ogt, %21, %22 : vector<8x32xf32>
    %cst_18 = arith.constant 2.000000e-01 : f32
    %24 = vector.broadcast %cst_18 : f32 to vector<8x32xf32>
    %25 = arith.mulf %24, %21 : vector<8x32xf32>
    %26 = arith.select %23, %21, %25 : vector<8x32xi1>, vector<8x32xf32>
    %27 = arith.truncf %26 : vector<8x32xf32> to vector<8x32xbf16>
    %c0_19 = arith.constant 0 : index
    %c0_20 = arith.constant 0 : index
    %28 = vector.load %arg9[%c0_19, %c0_20] : memref<32x32xbf16, #tpu.memory_space<vmem>>, vector<32x32xbf16>
    %cst_21 = arith.constant dense<0.000000e+00> : vector<8x32xf32>
    %29 = tpu.matmul %27, %28, %cst_21 {dimension_numbers = #tpu.dot_dimension_numbers<[1], [0], [0], [1], [0, 0, 1, 1], [], []>} : vector<8x32xbf16>, vector<32x32xbf16>, vector<8x32xf32> -> vector<8x32xf32>
    %30 = arith.addf %29, %2 : vector<8x32xf32>
    %c0_22 = arith.constant 0 : index
    %c0_23 = arith.constant 0 : index
    %31 = vector.load %arg10[%c0_22, %c0_23] : memref<1x32xf32, #tpu.memory_space<vmem>>, vector<1x32xf32>
    %32 = vector.broadcast %31 : vector<1x32xf32> to vector<8x32xf32>
    %33 = arith.addf %30, %32 : vector<8x32xf32>
    %cst_24 = arith.constant 0.000000e+00 : f32
    %34 = vector.broadcast %cst_24 : f32 to vector<8x32xf32>
    %35 = arith.cmpf ogt, %33, %34 : vector<8x32xf32>
    %cst_25 = arith.constant 2.000000e-01 : f32
    %36 = vector.broadcast %cst_25 : f32 to vector<8x32xf32>
    %37 = arith.mulf %36, %33 : vector<8x32xf32>
    %38 = arith.select %35, %33, %37 : vector<8x32xi1>, vector<8x32xf32>
    %39 = arith.truncf %38 : vector<8x32xf32> to vector<8x32xbf16>
    %c0_26 = arith.constant 0 : index
    %c0_27 = arith.constant 0 : index
    %40 = vector.load %arg11[%c0_26, %c0_27] : memref<32x32xbf16, #tpu.memory_space<vmem>>, vector<32x32xbf16>
    %cst_28 = arith.constant dense<0.000000e+00> : vector<8x32xf32>
    %41 = tpu.matmul %39, %40, %cst_28 {dimension_numbers = #tpu.dot_dimension_numbers<[1], [0], [0], [1], [0, 0, 1, 1], [], []>} : vector<8x32xbf16>, vector<32x32xbf16>, vector<8x32xf32> -> vector<8x32xf32>
    %c0_29 = arith.constant 0 : index
    %c0_30 = arith.constant 0 : index
    %42 = vector.load %arg12[%c0_29, %c0_30] : memref<1x32xf32, #tpu.memory_space<vmem>>, vector<1x32xf32>
    %43 = vector.broadcast %42 : vector<1x32xf32> to vector<8x32xf32>
    %44 = arith.addf %41, %43 : vector<8x32xf32>
    %cst_31 = arith.constant 0.000000e+00 : f32
    %45 = vector.broadcast %cst_31 : f32 to vector<8x32xf32>
    %46 = arith.cmpf ogt, %44, %45 : vector<8x32xf32>
    %cst_32 = arith.constant 2.000000e-01 : f32
    %47 = vector.broadcast %cst_32 : f32 to vector<8x32xf32>
    %48 = arith.mulf %47, %44 : vector<8x32xf32>
    %49 = arith.select %46, %44, %48 : vector<8x32xi1>, vector<8x32xf32>
    %c0_33 = arith.constant 0 : index
    %c0_34 = arith.constant 0 : index
    %50 = vector.load %arg13[%c0_33, %c0_34] : memref<1x32xbf16, #tpu.memory_space<vmem>>, vector<1x32xbf16>
    %51 = arith.truncf %49 : vector<8x32xf32> to vector<8x32xbf16>
    %cst_35 = arith.constant dense<0.000000e+00> : vector<1x8xf32>
    %52 = tpu.matmul %50, %51, %cst_35 {dimension_numbers = #tpu.dot_dimension_numbers<[1], [1], [0], [0], [0, 0, 1, 0], [], []>} : vector<1x32xbf16>, vector<8x32xbf16>, vector<1x8xf32> -> vector<1x8xf32>
    %c0_36 = arith.constant 0 : index
    %c0_37 = arith.constant 0 : index
    %53 = vector.load %arg14[%c0_36, %c0_37] : memref<1x1xf32, #tpu.memory_space<vmem>>, vector<1x1xf32>
    %54 = vector.broadcast %53 : vector<1x1xf32> to vector<1x8xf32>
    %55 = arith.addf %52, %54 : vector<1x8xf32>
    %56 = arith.negf %55 : vector<1x8xf32>
    %57 = math.exp %56 : vector<1x8xf32>
    %cst_38 = arith.constant 1.000000e+00 : f32
    %58 = vector.broadcast %cst_38 : f32 to vector<1x8xf32>
    %59 = arith.addf %58, %57 : vector<1x8xf32>
    %60 = arith.divf %58, %59 : vector<1x8xf32>
    %cst_39 = arith.constant 1.000000e-07 : f32
    %cst_40 = arith.constant 0.99999988 : f32
    %61 = vector.broadcast %cst_39 : f32 to vector<1x8xf32>
    %62 = arith.maximumf %61, %60 : vector<1x8xf32>
    %63 = vector.broadcast %cst_40 : f32 to vector<1x8xf32>
    %64 = arith.minimumf %63, %62 : vector<1x8xf32>
    %65 = vector.shape_cast %64 : vector<1x8xf32> to vector<1x1x8xf32>
    %c0_41 = arith.constant 0 : index
    %c0_42 = arith.constant 0 : index
    %c0_43 = arith.constant 0 : index
    %66 = vector.load %arg15[%c0_41, %c0_42, %c0_43] : memref<1x1x8xf32, #tpu.memory_space<vmem>>, vector<1x1x8xf32>
    tpu.vector_store %arg15[%c0_41, %c0_42, %c0_43], %65 {strides = array<i32>} : memref<1x1x8xf32, #tpu.memory_space<vmem>>, vector<1x1x8xf32>,
    return
  }
  func.func @transform_0(%arg0: i32) -> (i32, i32) {
    %c0_i32 = arith.constant 0 : i32
    %c0_i32_0 = arith.constant 0 : i32
    return %arg0, %c0_i32 : i32, i32
  }
  func.func @transform_1(%arg0: i32) -> (i32, i32) {
    %c0_i32 = arith.constant 0 : i32
    %c0_i32_0 = arith.constant 0 : i32
    return %arg0, %c0_i32 : i32, i32
  }
  func.func @transform_2(%arg0: i32) -> (i32, i32) {
    %c0_i32 = arith.constant 0 : i32
    %c0_i32_0 = arith.constant 0 : i32
    %c0_i32_1 = arith.constant 0 : i32
    return %c0_i32, %c0_i32_0 : i32, i32
  }
  func.func @transform_3(%arg0: i32) -> (i32, i32) {
    %c0_i32 = arith.constant 0 : i32
    %c0_i32_0 = arith.constant 0 : i32
    %c0_i32_1 = arith.constant 0 : i32
    return %c0_i32, %c0_i32_0 : i32, i32
  }
  func.func @transform_4(%arg0: i32) -> (i32, i32) {
    %c0_i32 = arith.constant 0 : i32
    %c0_i32_0 = arith.constant 0 : i32
    %c0_i32_1 = arith.constant 0 : i32
    return %c0_i32, %c0_i32_0 : i32, i32
  }
  func.func @transform_5(%arg0: i32) -> (i32, i32) {
    %c0_i32 = arith.constant 0 : i32
    %c0_i32_0 = arith.constant 0 : i32
    %c0_i32_1 = arith.constant 0 : i32
    return %c0_i32, %c0_i32_0 : i32, i32
  }
  func.func @transform_6(%arg0: i32) -> (i32, i32) {
    %c0_i32 = arith.constant 0 : i32
    %c0_i32_0 = arith.constant 0 : i32
    %c0_i32_1 = arith.constant 0 : i32
    return %c0_i32, %c0_i32_0 : i32, i32
  }
  func.func @transform_7(%arg0: i32) -> (i32, i32) {
    %c0_i32 = arith.constant 0 : i32
    %c0_i32_0 = arith.constant 0 : i32
    %c0_i32_1 = arith.constant 0 : i32
    return %c0_i32, %c0_i32_0 : i32, i32
  }
  func.func @transform_8(%arg0: i32) -> (i32, i32) {
    %c0_i32 = arith.constant 0 : i32
    %c0_i32_0 = arith.constant 0 : i32
    %c0_i32_1 = arith.constant 0 : i32
    return %c0_i32, %c0_i32_0 : i32, i32
  }
  func.func @transform_9(%arg0: i32) -> (i32, i32) {
    %c0_i32 = arith.constant 0 : i32
    %c0_i32_0 = arith.constant 0 : i32
    %c0_i32_1 = arith.constant 0 : i32
    return %c0_i32, %c0_i32_0 : i32, i32
  }
  func.func @transform_10(%arg0: i32) -> (i32, i32) {
    %c0_i32 = arith.constant 0 : i32
    %c0_i32_0 = arith.constant 0 : i32
    %c0_i32_1 = arith.constant 0 : i32
    return %c0_i32, %c0_i32_0 : i32, i32
  }
  func.func @transform_11(%arg0: i32) -> (i32, i32) {
    %c0_i32 = arith.constant 0 : i32
    %c0_i32_0 = arith.constant 0 : i32
    %c0_i32_1 = arith.constant 0 : i32
    return %c0_i32, %c0_i32_0 : i32, i32
  }
  func.func @transform_12(%arg0: i32) -> (i32, i32) {
    %c0_i32 = arith.constant 0 : i32
    %c0_i32_0 = arith.constant 0 : i32
    %c0_i32_1 = arith.constant 0 : i32
    return %c0_i32, %c0_i32_0 : i32, i32
  }
  func.func @transform_13(%arg0: i32) -> (i32, i32) {
    %c0_i32 = arith.constant 0 : i32
    %c0_i32_0 = arith.constant 0 : i32
    %c0_i32_1 = arith.constant 0 : i32
    return %c0_i32, %c0_i32_0 : i32, i32
  }
  func.func @transform_14(%arg0: i32) -> (i32, i32, i32) {
    %c0_i32 = arith.constant 0 : i32
    %c0_i32_0 = arith.constant 0 : i32
    %c0_i32_1 = arith.constant 0 : i32
    return %arg0, %c0_i32, %c0_i32_0 : i32, i32, i32
  }
}

</mosaic_0001>

<bundles_post_ra>
// kernel: reward_agent_forward.1
= control target key start
LH: loop header
LB: loop body
LE: loop exit
PB: predicated region body
PF: predicated region fallthrough
CT: control target
= control target key end

     0   :  { %s1580_s0 = inlined_call_operand.vmem [shape: f32[8,392], index: 0, kind: input, shape index: {}]   ;;  %s1581_s1 = inlined_call_operand.vmem [shape: f32[8,32], index: 1, kind: input, shape index: {}]   ;;  %s1582_s2 = inlined_call_operand.vmem [shape: bf16[392,196], index: 2, kind: input, shape index: {}]   ;;  %s1583_s3 = inlined_call_operand.vmem [shape: f32[1,196], index: 3, kind: input, shape index: {}]   ;;  %s1584_s4 = inlined_call_operand.vmem [shape: bf16[196,64], index: 4, kind: input, shape index: {}]   ;;  %s1585_s5 = inlined_call_operand.vmem [shape: f32[1,64], index: 5, kind: input, shape index: {}]   ;;  %s1586_s6 = inlined_call_operand.vmem [shape: bf16[64,32], index: 6, kind: input, shape index: {}]   ;;  %s1587_s7 = inlined_call_operand.vmem [shape: f32[1,32], index: 7, kind: input, shape index: {}]   ;;  %s1588_s8 = inlined_call_operand.vmem [shape: bf16[32,32], index: 8, kind: input, shape index: {}]   ;;  %s1589_s9 = inlined_call_operand.vmem [shape: f32[1,32], index: 9, kind: input, shape index: {}]   ;;  %s1590_s10 = inlined_call_operand.vmem [shape: bf16[32,32], index: 10, kind: input, shape index: {}]   ;;  %s1591_s11 = inlined_call_operand.vmem [shape: f32[1,32], index: 11, kind: input, shape index: {}]   ;;  %s1592_s12 = inlined_call_operand.vmem [shape: bf16[1,32], index: 12, kind: input, shape index: {}]   ;;  %s1593_s13 = inlined_call_operand.<no memory space> [shape: f32[1,1], index: 13, kind: input, shape index: {}]   ;;  %s1594_s14 = inlined_call_operand.hbm [shape: f32[1,1,8], index: 14, kind: output, shape index: {}]  }
   0x1   :  { %v19_v0 = vstv %s1593_s13 }
   0x2   :  { %20 = vst [vmem:[#allocation2] sm:$0x1] %v19_v0 }
   0x3   :  { %v1071_v1 = vld [vmem:[%s1582_s2 + $0x4] ss:$8 sps:$4 sm:$0xff]   ;;  %v1073_v2 = vld [vmem:[%s1582_s2] ss:$8 sps:$4 sm:$0xff]   ;;  %v1074_v3 = vld [vmem:[%s1582_s2 + $0x14] ss:$8 sps:$4 sm:$0xff]  }
   0x4   :  { %377 = vmatprep.subr.bf16.mxu0 %v1071_v1  ;;  %v1200_v4 = vmov 0   ;;  %v1076_v5 = vld [vmem:[%s1582_s2 + $0x10] ss:$8 sps:$4 sm:$0xff]   ;;  %v1077_v6 = vld [vmem:[%s1582_s2 + $0x24] ss:$8 sps:$4 sm:$0xff]  }
   0x5   :  { %578 = vmatprep.subr.bf16.mxu1 %v1200_v4  ;;  %378 = vmatpush1.bf16.msra.mxu0 %v1073_v2  ;;  %v1079_v7 = vld [vmem:[%s1582_s2 + $0x20] ss:$8 sps:$4 sm:$0xff]   ;;  %v1080_v8 = vld [vmem:[%s1582_s2 + $0x34] ss:$8 sps:$4 sm:$0xff]   ;;  %v1082_v9 = vld [vmem:[%s1582_s2 + $0x30] ss:$8 sps:$4 sm:$0xff]  }
   0x6   :  { %1070 = vset.pattern.permute.xlu0 %v1200_v4  ;;  %379 = vmatprep.subr.bf16.mxu0 %v1074_v3  ;;  %v1083_v10 = vld [vmem:[%s1582_s2 + $0x44] ss:$8 sps:$4 sm:$0xff]   ;;  %v1085_v11 = vld [vmem:[%s1582_s2 + $0x40] ss:$8 sps:$4 sm:$0xff]   ;;  %v1086_v12 = vld [vmem:[%s1582_s2 + $0x54] ss:$8 sps:$4 sm:$0xff]  }
   0x7   :  { %v1088_v13 = vld [vmem:[%s1582_s2 + $0x50] ss:$8 sps:$4 sm:$0xff]   ;;  %v1089_v14 = vld [vmem:[%s1582_s2 + $0x64] ss:$8 sps:$4 sm:$0xff]   ;;  %v1091_v17 = vld [vmem:[%s1582_s2 + $0x60] ss:$8 sps:$4 sm:$0xff]  }
   0x8   :  { %v52_v15 = vld [vmem:[%s1580_s0 + $0x8] sm:$0xff]  ;;  %v1092_v18 = vld [vmem:[%s1582_s2 + $0x74] ss:$8 sps:$4 sm:$0xff]   ;;  %v1094_v19 = vld [vmem:[%s1582_s2 + $0x70] ss:$8 sps:$4 sm:$0xff]  }
   0x9   :  { %380 = vmatpush1.bf16.msra.mxu0 %v1076_v5  ;;  %v56_v16 = vpack.c.bf16 %v52_v15, %v52_v15  ;;  %v1095_v20 = vld [vmem:[%s1582_s2 + $0x84] ss:$8 sps:$4 sm:$0xff]   ;;  %v1097_v21 = vld [vmem:[%s1582_s2 + $0x80] ss:$8 sps:$4 sm:$0xff]   ;;  %v1098_v22 = vld [vmem:[%s1582_s2 + $0x94] ss:$8 sps:$4 sm:$0xff]  }
   0xa   :  { %381 = vmatprep.subr.bf16.mxu0 %v1077_v6  ;;  %v1100_v23 = vld [vmem:[%s1582_s2 + $0x90] ss:$8 sps:$4 sm:$0xff]   ;;  %v1145_v24 = vld [vmem:[%s1584_s4] sm:$0xff]   ;;  %v1146_v26 = vld [vmem:[%s1584_s4 + $0x8] sm:$0xff]  }
   0xb   :  { %409 = vmatprep.mubr.bf16.mxu0 %v56_v16  ;;  %v1101_v25 = vld [vmem:[%s1582_s2 + $0xa4] ss:$8 sps:$4 sm:$0xff]   ;;  %579 = vmatpush1.bf16.msra.mxu1 %v1145_v24  ;;  %v1103_v27 = vld [vmem:[%s1582_s2 + $0xa0] ss:$8 sps:$4 sm:$0xff]   ;;  %v1104_v28 = vld [vmem:[%s1582_s2 + $0xb4] ss:$8 sps:$4 sm:$0xff]  }
   0xc   :  { %580 = vmatprep.subr.bf16.mxu1 %v1200_v4  ;;  %v1147_v29 = vld [vmem:[%s1584_s4 + $0x10] sm:$0xff]   ;;  %v1107_v31 = vld [vmem:[%s1582_s2 + $0xc4] ss:$8 sps:$4 sm:$0xff]   ;;  %v1148_v32 = vld [vmem:[%s1584_s4 + $0x18] sm:$0xff]  }
   0xd   :  { %382 = vmatpush1.bf16.msra.mxu0 %v1079_v7  ;;  %v1106_v30 = vld [vmem:[%s1582_s2 + $0xb0] ss:$8 sps:$4 sm:$0xff]   ;;  %v1109_v33 = vld [vmem:[%s1582_s2 + $0xc0] ss:$8 sps:$4 sm:$0xff]   ;;  %v1110_v34 = vld [vmem:[%s1582_s2 + $0xd4] ss:$8 sps:$4 sm:$0xff]  }
   0xe   :  { %383 = vmatprep.subr.bf16.mxu0 %v1080_v8  ;;  %v1149_v35 = vld [vmem:[%s1584_s4 + $0x20] sm:$0xff]  }
   0xf   :  { %581 = vmatpush1.bf16.msra.mxu1 %v1146_v26 }
  0x10   :  { %582 = vmatprep.subr.bf16.mxu1 %v1200_v4 }
  0x11   :  { %384 = vmatpush1.bf16.msra.mxu0 %v1082_v9 }
  0x12   :  { %385 = vmatprep.subr.bf16.mxu0 %v1083_v10 }
  0x13   :  { %583 = vmatpush1.bf16.msra.mxu1 %v1147_v29 }
  0x14   :  { %584 = vmatprep.subr.bf16.mxu1 %v1200_v4 }
  0x15   :  { %386 = vmatpush1.bf16.msra.mxu0 %v1085_v11 }
  0x16   :  { %387 = vmatprep.subr.bf16.mxu0 %v1086_v12 }
  0x17   :  { %585 = vmatpush1.bf16.msra.mxu1 %v1148_v32 }
  0x18   :  { %586 = vmatprep.subr.bf16.mxu1 %v1200_v4 }
  0x19   :  { %388 = vmatpush1.bf16.msra.mxu0 %v1088_v13 }
  0x1a   :  { %389 = vmatprep.subr.bf16.mxu0 %v1089_v14 }
  0x1d   :  { %390 = vmatpush1.bf16.msra.mxu0 %v1091_v17 }
  0x1e   :  { %391 = vmatprep.subr.bf16.mxu0 %v1092_v18 }
  0x21   :  { %392 = vmatpush1.bf16.msra.mxu0 %v1094_v19 }
  0x22   :  { %393 = vmatprep.subr.bf16.mxu0 %v1095_v20 }
  0x25   :  { %394 = vmatpush1.bf16.msra.mxu0 %v1097_v21 }
  0x26   :  { %395 = vmatprep.subr.bf16.mxu0 %v1098_v22 }
  0x29   :  { %396 = vmatpush1.bf16.msra.mxu0 %v1100_v23 }
  0x2a   :  { %397 = vmatprep.subr.bf16.mxu0 %v1101_v25 }
  0x2d   :  { %398 = vmatpush1.bf16.msra.mxu0 %v1103_v27 }
  0x2e   :  { %399 = vmatprep.subr.bf16.mxu0 %v1104_v28 }
  0x31   :  { %400 = vmatpush1.bf16.msra.mxu0 %v1106_v30 }
  0x32   :  { %401 = vmatprep.subr.bf16.mxu0 %v1107_v31 }
  0x33   :  { %21 = vsyncpa [#allocation4], 0  ;;  %v1112_v36 = vld [vmem:[%s1582_s2 + $0xd0] ss:$8 sps:$4 sm:$0xff]   ;;  %v1113_v37 = vld [vmem:[%s1582_s2 + $0xe4] ss:$8 sps:$4 sm:$0xff]   ;;  %587 = vmatpush1.bf16.msra.mxu1 %v1149_v35  ;;  %v111_v13 = vlaneseq }
  0x34   :  { %v1150_v38 = vld [vmem:[%s1584_s4 + $0x28] sm:$0xff]   ;;  %588 = vmatprep.subr.bf16.mxu1 %v1200_v4  ;;  %v1116_v40 = vld [vmem:[%s1582_s2 + $0xf4] ss:$8 sps:$4 sm:$0xff]   ;;  %v1118_v42 = vld [vmem:[%s1582_s2 + $0xf0] ss:$8 sps:$4 sm:$0xff]   ;;  %vm366_vm0 = vcmask 64512  }
  0x35   :  { %402 = vmatpush1.bf16.msra.mxu0 %v1109_v33  ;;  %v1115_v39 = vld [vmem:[%s1582_s2 + $0xe0] ss:$8 sps:$4 sm:$0xff]   ;;  %v1151_v41 = vld [vmem:[%s1584_s4 + $0x30] sm:$0xff]   ;;  %v1121_v44 = vld [vmem:[%s1582_s2 + $0x104] ss:$8 sps:$4 sm:$0xff]   ;;  %vm370_vm1 = vcmask 1043456  }
  0x36   :  { %403 = vmatprep.subr.bf16.mxu0 %v1110_v34  ;;  %v51_v43 = vld [vmem:[%s1580_s0] sm:$0xff]  ;;  %v54_v45 = vld [vmem:[%s1580_s0 + $0x18] sm:$0xff]  ;;  %v53_v5 = vld [vmem:[%s1580_s0 + $0x10] sm:$0xff]  ;;  %vm574_vm2 = vcmask 1041408   ;;  %v1494_v14 = vshrl.u32 %v111_v13, 7  ;;  %vm570_vm3 = vcmask 556032  }
  0x37   :  { %589 = vmatpush1.bf16.msra.mxu1 %v1150_v38  ;;  %v1152_v46 = vld [vmem:[%s1584_s4 + $0x38] sm:$0xff]   ;;  %v55_v47 = vpack.c.bf16 %v51_v43, %v51_v43  ;;  %v1119_v48 = vld [vmem:[%s1582_s2 + $0x100] ss:$8 sps:$4 sm:$0xff]   ;;  %v58_v49 = vpack.c.bf16 %v54_v45, %v54_v45  ;;  %v1127_v53 = vld [vmem:[%s1582_s2 + $0x124] ss:$8 sps:$4 sm:$0xff]   ;;  %v57_v7 = vpack.c.bf16 %v53_v5, %v53_v5  ;;  %v1201_v30 = vmov 0.0  }
  0x38   :  { %590 = vmatprep.subr.bf16.mxu1 %v1200_v4  ;;  %v1124_v50 = vld [vmem:[%s1582_s2 + $0x114] ss:$8 sps:$4 sm:$0xff]   ;;  %v1153_v51 = vld [vmem:[%s1584_s4 + $0x40] sm:$0xff]   ;;  %v1122_v52 = vld [vmem:[%s1582_s2 + $0x110] ss:$8 sps:$4 sm:$0xff]   ;;  %v113_v15 = vsub.s32 0, %v1494_v14 }
  0x39   :  { %404 = vmatpush1.bf16.msra.mxu0 %v1112_v36  ;;  %v1125_v54 = vld [vmem:[%s1582_s2 + $0x120] ss:$8 sps:$4 sm:$0xff]   ;;  %v1130_v55 = vld [vmem:[%s1582_s2 + $0x134] ss:$8 sps:$4 sm:$0xff]   ;;  %v1128_v56 = vld [vmem:[%s1582_s2 + $0x130] ss:$8 sps:$4 sm:$0xff]  }
  0x3a   :  { %405 = vmatprep.subr.bf16.mxu0 %v1113_v37  ;;  %v1133_v57 = vld [vmem:[%s1582_s2 + $0x144] ss:$8 sps:$4 sm:$0xff]   ;;  %v1131_v58 = vld [vmem:[%s1582_s2 + $0x140] ss:$8 sps:$4 sm:$0xff]   ;;  %v1136_v59 = vld [vmem:[%s1582_s2 + $0x154] ss:$8 sps:$4 sm:$0xff]  }
  0x3b   :  { %591 = vmatpush1.bf16.msra.mxu1 %v1151_v41  ;;  %v1134_v60 = vld [vmem:[%s1582_s2 + $0x150] ss:$8 sps:$4 sm:$0xff]   ;;  %v1139_v61 = vld [vmem:[%s1582_s2 + $0x164] ss:$8 sps:$4 sm:$0xff]   ;;  %v1137_v62 = vld [vmem:[%s1582_s2 + $0x160] ss:$8 sps:$4 sm:$0xff]  }
  0x3c   :  { %592 = vmatprep.subr.bf16.mxu1 %v1200_v4  ;;  %v1142_v63 = vld [vmem:[%s1582_s2 + $0x174] ss:$8 sps:$4 sm:$0xff]   ;;  %v108_v0 = vld [vmem:[%s1582_s2 + $0x180] sm:$0xff]  ;;  %v1140_v1 = vld [vmem:[%s1582_s2 + $0x170] ss:$8 sps:$4 sm:$0xff]   ;;  %v117_v17 = vsub.s32 1, %v1494_v14 }
  0x3d   :  { %406 = vmatpush1.bf16.msra.mxu0 %v1115_v39  ;;  %v979_v2 = vcombine.high %v108_v0, %v108_v0  ;;  %v978_v3 = vcombine.low %v108_v0, %v108_v0  ;;  %v1154_v8 = vld [vmem:[%s1584_s4 + $0x48] sm:$0xff]   ;;  %v1155_v9 = vld [vmem:[%s1584_s4 + $0x50] sm:$0xff]   ;;  %v1156_v10 = vld [vmem:[%s1584_s4 + $0x58] sm:$0xff]   ;;  %vm1202_vm4 = vmmov 0   ;;  %vm659_vm5 = vcmask 523264  }
  0x3e   :  { %407 = vmatprep.subr.bf16.mxu0 %v1116_v40  ;;  %v1157_v11 = vld [vmem:[%s1584_s4 + $0x60] ss:$0 sps:$4 sm:$0x33]   ;;  %v1159_v31 = vld [vmem:[%s1586_s6 + $0x8] sm:$0xff]   ;;  %v1160_v32 = vld [vmem:[%s1586_s6 + $0x10] sm:$0xff]   ;;  %vm723_vm7 = vcmask 261120  }
  0x3f   :  { %593 = vmatpush1.bf16.msra.mxu1 %v1152_v46  ;;  %v372_v6 = vsel %vm370_vm1, %v978_v3, 0  ;;  %v576_v12 = vsel %vm574_vm2, %v1157_v11, 0  ;;  %v109_v16 = vld [vmem:[%s1583_s3] sm:$0x3]  ;;  %v1161_v33 = vld [vmem:[%s1586_s6 + $0x18] sm:$0xff]   ;;  %v1163_v43 = vld [vmem:[%s1588_s8 + $0x8] sm:$0xff]  }
  0x40   :  { %594 = vmatprep.subr.bf16.mxu1 %v1200_v4  ;;  %v118_v18 = vrot.slane %v109_v16, %v117_v17  ;;  %v1158_v29 = vld [vmem:[%s1586_s6] sm:$0xff]   ;;  %vm914_vm10 = vcmask 57344  }
  0x41   :  { %408 = vmatpush1.bf16.msra.mxu0 %v1118_v42  ;;  %v982_v34 = vld [vmem:[%s1585_s5] ss:$0 sm:$0xff] }
  0x42   :  { %418 = vmatprep.subr.bf16.mxu0 %v1121_v44  ;;  %v1162_v42 = vld [vmem:[%s1588_s8] sm:$0xff]  }
  0x43   :  { %595 = vmatpush1.bf16.msra.mxu1 %v1153_v51  ;;  %v997_v44 = vld [vmem:[%s1587_s7] ss:$0 sm:$0xff] }
  0x44   :  { %410 = vmatmul.mubr.bf16.vlgmr.msra.gmra.mrb[0].mxu0 %v55_v47  ;;  %596 = vmatprep.subr.bf16.mxu1 %v1200_v4  ;;  %v1007_v3 = vld [vmem:[%s1591_s11] ss:$0 sm:$0xff]  ;;  %s1203_s11 = smov [#allocation3]  }
  0x45   :  { %419 = vmatpush1.bf16.msra.mxu0 %v1119_v48  ;;  %981 = vmatprep.mubr.msk.bf16.mxu0 %vm366_vm0, %v58_v49  ;;  %s922_s3 = sshll.u32 %s1203_s11, 4  ;;  %s923_s3 = int_to_ptr.vmem [resolvable:$true] %s922_s3 }
  0x46   :  { %420 = vmatprep.subr.bf16.mxu0 %v1124_v50  ;;  %s1180_s4 = scalar_lea.vmem %s923_s3, 32  ;;  %p1181_p1 = scmp.lt.s32.totalorder %s923_s3, %s923_s3 }
  0x47   :  { %597 = vmatpush1.bf16.msra.mxu1 %v1154_v8 }
  0x48   :  { %598 = vmatprep.subr.bf16.mxu1 %v1200_v4 }
  0x49   :  { %421 = vmatpush1.bf16.msra.mxu0 %v1122_v52 }
  0x4a   :  { %422 = vmatprep.subr.bf16.mxu0 %v1127_v53  ;;  %v1164_v53 = vld [vmem:[%s1590_s10] sm:$0xff]  }
  0x4b   :  { %599 = vmatpush1.bf16.msra.mxu1 %v1155_v9 }
  0x4c   :  { %600 = vmatprep.subr.bf16.mxu1 %v1200_v4 }
  0x4d   :  { %423 = vmatpush1.bf16.msra.mxu0 %v1125_v54  ;;  %v1165_v54 = vld [vmem:[%s1590_s10 + $0x8] sm:$0xff]  }
  0x4e   :  { %424 = vmatprep.subr.bf16.mxu0 %v1130_v55  ;;  %v59_v55 = vld [vmem:[%s1581_s1] sm:$0xff] }
  0x4f   :  { %601 = vmatpush1.bf16.msra.mxu1 %v1156_v10 }
  0x50   :  { %602 = vmatprep.subr.bf16.mxu1 %v1200_v4  ;;  %v114_v4 = vrot.slane %v109_v16, %v113_v15  ;;  %v848_v16 = vld [vmem:[%s1592_s12] sm:$0x1]  ;;  %s1176_s12 = scalar_lea.vmem %s923_s3, 16 }
  0x51   :  { %425 = vmatpush1.bf16.msra.mxu0 %v1128_v56  ;;  %p1177_p0 = scmp.ne.s32.totalorder %s923_s3, %s1176_s12  ;;  %p1182_p2 = scmp.lt.s32.totalorder %s1180_s4, %s1176_s12 }
  0x52   :  { %426 = vmatprep.subr.bf16.mxu0 %v1133_v57  ;;  %v1006_v57 = vld [vmem:[%s1589_s9] ss:$0 sm:$0xff] }
  0x53   :  { %603 = vmatpush1.bf16.msra.mxu1 %v576_v12  ;;  %p1183_p3 = por %p1182_p2, %p1181_p1 }
  0x54   :  { %1026 = vmatprep.subr.bf16.mxu1 %v1201_v30 }
  0x55   :  { %427 = vmatpush1.bf16.msra.mxu0 %v1131_v58  ;;  %p1184_p4 = pnand %p1183_p3, %p1177_p0 }
  0x56   :  { %428 = vmatprep.subr.bf16.mxu0 %v1136_v59 }
  0x59   :  { %429 = vmatpush1.bf16.msra.mxu0 %v1134_v60 }
  0x5a   :  { %430 = vmatprep.subr.bf16.mxu0 %v1139_v61 }
  0x5d   :  { %431 = vmatpush1.bf16.msra.mxu0 %v1137_v62 }
  0x5e   :  { %432 = vmatprep.subr.bf16.mxu0 %v1142_v63 }
  0x61   :  { %433 = vmatpush1.bf16.msra.mxu0 %v1140_v1 }
  0x62   :  { %980 = vmatprep.subr.msk.bf16.mxu0 %vm370_vm1, %v979_v2  ;;  %v850_v2 = vld [vmem:[#allocation2] sm:$0x1] }
  0x63   :  { %853 = vperm.xlu0 %1070, %v850_v2  }
  0x65   :  { %435 = vmatpush1.bf16.msra.mxu0 %v372_v6 }
  0x68   :  { %451 = vmatmul.mubr.bf16.vlgmr.msra.gmra.mrb[0].mxu0 %v57_v7 }
  0xe2   :  { %v854_v17 = vpop.permute.xlu0 %853 }
 0x13b   :  { %v452_v19 = vpop.f32.mrb[0].mxu0 }
 0x13c   :  { %v1060_v20 = vadd.f32 %v452_v19, %v114_v4  ;;  %v454_v21 = vpop.f32.mrb[1].mxu0  ;;  %v859_v4 = vrot.slane %v854_v17, %v113_v15 }
 0x13d   :  { %v1061_v22 = vadd.f32 %v454_v21, %v118_v18  ;;  %v456_v23 = vpop.f32.mrb[2].mxu0 }
 0x13e   :  { %1166 = vtanh.f32 %v1060_v20  ;;  %v457_v24 = vpop.f32.mrb[3].mxu0 }
 0x13f   :  { %1168 = vtanh.f32 %v1061_v22 }
 0x148   :  { %v1167_v25 = vpop.eup %1166 }
 0x149   :  { %v1169_v26 = vpop.eup %1168  ;;  %v461_v28 = vpack.c.bf16 %v1167_v25, %v1167_v25 }
 0x14a   :  { %v462_v27 = vpack.c.bf16 %v1169_v26, %v1169_v26 }
 0x14c   :  { %996 = vmatprep.mubr.msk.bf16.mxu1 %vm570_vm3, %v462_v27 }
 0x14d   :  { %611 = vmatmul.mubr.bf16.vlgmr.msra.gmra.mrb[0].mxu1 %v461_v28 }
 0x14e   :  { %1027 = vmatpush3.bf16.msra.mxu1 %v1158_v29  ;;  %1034 = vmatprep.mubr.msk.bf16.mxu1 %vm1202_vm4, %v1201_v30 }
 0x14f   :  { %1028 = vmatprep.subr.bf16.mxu1 %v1201_v30 }
 0x152   :  { %1029 = vmatpush3.bf16.msra.mxu1 %v1159_v31 }
 0x153   :  { %1030 = vmatprep.subr.bf16.mxu1 %v1201_v30 }
 0x156   :  { %1031 = vmatpush3.bf16.msra.mxu1 %v1160_v32 }
 0x157   :  { %1032 = vmatprep.subr.bf16.mxu1 %v1201_v30 }
 0x15a   :  { %1033 = vmatpush3.bf16.msra.mxu1 %v1161_v33 }
 0x15b   :  { %1038 = vmatprep.subr.bf16.mxu1 %v1201_v30 }
 0x220   :  { %v612_v35 = vpop.f32.mrb[0].mxu1 }
 0x221   :  { %v613_v36 = vadd.f32 %v982_v34, %v612_v35  ;;  %v614_v37 = vpop.f32.mrb[1].mxu1 }
 0x222   :  { %v615_v38 = vpop.f32.mrb[2].mxu1 }
 0x223   :  { %1170 = vtanh.f32 %v613_v36  ;;  %v616_v39 = vpop.f32.mrb[3].mxu1 }
 0x22d   :  { %v1171_v40 = vpop.eup %1170 }
 0x22e   :  { %v619_v41 = vpack.c.bf16 %v1171_v40, %v1171_v40 }
 0x230   :  { %1035 = vmatmul.mubr.msk.bf16.vlgmr.msra.gmra.mrb[4].mxu1 %vm659_vm5, %v619_v41 }
 0x231   :  { %1042 = vmatprep.mubr.msk.bf16.mxu1 %vm1202_vm4, %v1201_v30  ;;  %1039 = vmatpush3.bf16.msra.mxu1 %v1162_v42 }
 0x232   :  { %1040 = vmatprep.subr.bf16.mxu1 %v1201_v30 }
 0x235   :  { %1041 = vmatpush3.bf16.msra.mxu1 %v1163_v43 }
 0x236   :  { %1046 = vmatprep.subr.bf16.mxu1 %v1201_v30 }
 0x303   :  { %v697_v45 = vpop.f32.mrb[4].mxu1 }
 0x304   :  { %v698_v46 = vadd.f32 %v997_v44, %v697_v45  ;;  %v1036_v47 = vpop.f32.mrb[5].mxu1 }
 0x305   :  { %v700_v48 = vpop.f32.mrb[6].mxu1 }
 0x306   :  { %vm703_vm6 = vcmp.gt.f32.partialorder %v698_v46, 0.0  ;;  %v704_v49 = vmul.f32 0.2, %v698_v46  ;;  %v1037_v50 = vpop.f32.mrb[7].mxu1 }
 0x308   :  { %v705_v51 = vsel %vm703_vm6, %v698_v46, %v704_v49 }
 0x309   :  { %v706_v52 = vpack.c.bf16 %v705_v51, %v705_v51 }
 0x30b   :  { %1043 = vmatmul.mubr.msk.bf16.vlgmr.msra.gmra.mrb[8].mxu1 %vm723_vm7, %v706_v52 }
 0x30c   :  { %1050 = vmatprep.mubr.msk.bf16.mxu1 %vm1202_vm4, %v1201_v30  ;;  %1047 = vmatpush3.bf16.msra.mxu1 %v1164_v53 }
 0x30d   :  { %1048 = vmatprep.subr.bf16.mxu1 %v1201_v30 }
 0x310   :  { %1049 = vmatpush3.bf16.msra.mxu1 %v1165_v54 }
 0x311   :  { %1054 = vmatprep.subr.bf16.mxu1 %v1201_v30 }
 0x3de   :  { %v761_v56 = vpop.f32.mrb[8].mxu1 }
 0x3df   :  { %v762_v58 = vadd.f32 %v761_v56, %v59_v55  ;;  %v1044_v59 = vpop.f32.mrb[9].mxu1 }
 0x3e0   :  { %v764_v60 = vpop.f32.mrb[10].mxu1 }
 0x3e1   :  { %v774_v61 = vadd.f32 %v1006_v57, %v762_v58  ;;  %v1045_v62 = vpop.f32.mrb[11].mxu1 }
 0x3e3   :  { %vm775_vm8 = vcmp.gt.f32.partialorder %v774_v61, 0.0  ;;  %v776_v63 = vmul.f32 0.2, %v774_v61 }
 0x3e5   :  { %v777_v0 = vsel %vm775_vm8, %v774_v61, %v776_v63 }
 0x3e6   :  { %v778_v1 = vpack.c.bf16 %v777_v0, %v777_v0 }
 0x3e8   :  { %1051 = vmatmul.mubr.msk.bf16.vlgmr.msra.gmra.mrb[12].mxu1 %vm723_vm7, %v778_v1 }
 0x3e9   :  { %1056 = vmatprep.mubr.msk.bf16.mxu1 %vm1202_vm4, %v1201_v30 }
 0x4bb   :  { %v839_v5 = vpop.f32.mrb[12].mxu1 }
 0x4bc   :  { %v840_v6 = vadd.f32 %v1007_v3, %v839_v5  ;;  %v1052_v7 = vpop.f32.mrb[13].mxu1 }
 0x4bd   :  { %v842_v8 = vpop.f32.mrb[14].mxu1 }
 0x4be   :  { %vm845_vm9 = vcmp.gt.f32.partialorder %v840_v6, 0.0  ;;  %v846_v9 = vmul.f32 0.2, %v840_v6  ;;  %v1053_v10 = vpop.f32.mrb[15].mxu1 }
 0x4c0   :  { %v847_v11 = vsel %vm845_vm9, %v840_v6, %v846_v9 }
 0x4c1   :  { %v849_v12 = vpack.c.bf16 %v847_v11, %v847_v11 }
 0x4c3   :  { %v864_v13 = vsel %vm723_vm7, %v849_v12, 0 }
 0x4c4   :  { %1055 = vmatpush3.bf16.xpose.msra.mxu1 %v864_v13 }
 0x4cb   :  { %1057 = vmatmul.mubr.msk.bf16.vlgmr.msra.gmra.mrb[16].mxu1 %vm723_vm7, %v848_v16 }
 0x59e   :  { %v900_v18 = vpop.f32.mrb[16].mxu1 }
 0x59f   :  { %v901_v19 = vadd.f32 %v900_v18, %v859_v4  ;;  %v1058_v20 = vpop.f32.mrb[17].mxu1 }
 0x5a0   :  { %v903_v21 = vpop.f32.mrb[18].mxu1 }
 0x5a1   :  { %v1012_v22 = vmul.f32 -1.442695, %v901_v19  ;;  %v1059_v23 = vpop.f32.mrb[19].mxu1 }
 0x5a3   :  { %1172 = vpow2.f32 %v1012_v22 }
 0x5ad   :  { %v1173_v24 = vpop.eup %1172 }
 0x5ae   :  { %v909_v25 = vadd.f32 1.0, %v1173_v24 }
 0x5b0   :  { %1174 = vrcp.f32 %v909_v25 }
 0x5ba   :  { %v1175_v26 = vpop.eup %1174 }
 0x5bb   :  { %v912_v27 = vmax.f32 %v1175_v26, 1e-07 }
 0x5bd   :  { %v913_v28 = vmin.f32 %v912_v27, 0.9999999 }
 0x5bf   :  { %915 = vst.msk [vmem:[#allocation3] sm:$0x1] %vm914_vm10, %v913_v28 }
 0x5c0   :  { %1187 = shalt.err (!%p1184_p4)
}
 0x5c1   :  { %s1188_s29 = scalar_lea.hbm %s1594_s14, 16 }
 0x5c2   :  { %p1189_p5 = scmp.ne.s32.totalorder %s1594_s14, %s1188_s29  ;;  %p1192_p6 = scmp.lt.u32.totalorder %s1188_s29, %s1594_s14 }
 0x5c4   :  { %p1194_p7 = pnand %p1192_p6, %p1189_p5 }
 0x5c6   :  { %1197 = shalt.err (!%p1194_p7)
}
 0x5c7   :  { %925 = dma.vmem_to_hbm [thread:$0]  %s923_s3, 16, %s1594_s14, [#allocation4]  }
 0x5c8   :  { %1198 = dma.done.wait [#allocation4], 16  }
 0x5c9   :  { %1199 = vsyncadd [#allocation4], 4294967280 }
 0x5ca   :  { %929 = vsyncpa [#allocation4], 1 }

</bundles_post_ra>
